<compile_context>
chip_gen: v7x
topology: tpu7x:2x2x1
jax: 0.10.0
libtpu: 0.0.40
codegen_flags: <defaults>
</compile_context>

<pallas_src>
import jax
import jax.numpy as jnp
from jax.experimental import pallas as pl
from jax.experimental.pallas import tpu as pltpu


def _round_up(n, m):
    return ((n + m - 1) // m) * m


def _cdiv(a, b):
    return (a + b - 1) // b


def _mlp_kernel(x_ref, w1_ref, b1_ref, w2_ref, b2_ref, w3_ref, b3_ref, o_ref):
    # bf16 MXU operands (in-kernel cast rides a free VPU slot), f32 epilogue.
    x = x_ref[...].astype(jnp.bfloat16)
    # Layer 1: Linear + ReLU   (Dropout(0.2) is identity in eval mode)
    h1 = jnp.dot(x, w1_ref[...].astype(jnp.bfloat16),
                 preferred_element_type=jnp.float32)
    h1 = jnp.maximum(h1 + b1_ref[...], 0.0)
    # Layer 2: Linear + ReLU   (Dropout(0.1) is identity in eval mode)
    h2 = jnp.dot(h1.astype(jnp.bfloat16), w2_ref[...].astype(jnp.bfloat16),
                 preferred_element_type=jnp.float32)
    h2 = jnp.maximum(h2 + b2_ref[...], 0.0)
    # Regime head: Linear (narrow n_regimes-wide output block)
    logits = jnp.dot(h2.astype(jnp.bfloat16), w3_ref[...].astype(jnp.bfloat16),
                     preferred_element_type=jnp.float32)
    o_ref[...] = (logits + b3_ref[...]).astype(o_ref.dtype)


def _choose_tiling(B, batch_tile):
    """Balanced batch tiles: padding < one tile; >=2 tiles for big B (v7x 2 TCs)."""
    n_tiles = max(1, _cdiv(B, batch_tile))
    if B > 256:
        n_tiles = max(n_tiles, 2)
    tb = _round_up(_cdiv(B, n_tiles), 8)      # f32 sublane = 8 rows
    b_pad = _round_up(B, tb)
    return tb, b_pad, b_pad // tb


def regime_classifier_forward(x, params, *, batch_tile=1024):
    """x: (B, in_dim) float32. params: dict of w1,b1,w2,b2,w3,b3 (f32)."""
    w1, b1 = params["w1"], params["b1"]
    w2, b2 = params["w2"], params["b2"]
    w3, b3 = params["w3"], params["b3"]

    B, in_dim = x.shape
    hidden = w1.shape[1]
    half = w2.shape[1]
    n_regimes = w3.shape[1]

    tb, b_pad, n_tiles = _choose_tiling(B, batch_tile)

    # Only pad batch rows (cheap, and only when B is not a tile multiple).
    x_p = x if b_pad == B else jnp.pad(x, ((0, b_pad - B), (0, 0)))

    # Weights / biases: constant block index -> VMEM-resident across the grid.
    resident = lambda shape: pl.BlockSpec(shape, lambda i: (0, 0))

    flops = 2 * b_pad * (in_dim * hidden + hidden * half + half * n_regimes)
    bytes_accessed = 4 * (
        x_p.size + w1.size + b1.size + w2.size + b2.size + w3.size + b3.size
        + b_pad * n_regimes)

    out = pl.pallas_call(
        _mlp_kernel,
        out_shape=jax.ShapeDtypeStruct((b_pad, n_regimes), jnp.float32),
        grid=(n_tiles,),
        in_specs=[
            pl.BlockSpec((tb, in_dim), lambda i: (i, 0)),   # x: streamed per tile
            resident((in_dim, hidden)), resident((1, hidden)),
            resident((hidden, half)), resident((1, half)),
            resident((half, n_regimes)), resident((1, n_regimes)),
        ],
        out_specs=pl.BlockSpec((tb, n_regimes), lambda i: (i, 0)),
        compiler_params=pltpu.CompilerParams(
            dimension_semantics=("parallel",)),   # shard batch tiles across TCs (v7x)
        cost_estimate=pl.CostEstimate(
            flops=flops, transcendentals=0, bytes_accessed=bytes_accessed),
    )(x_p, w1, b1, w2, b2, w3, b3)

    return out if b_pad == B else out[:B]


def init_params(key, in_dim, hidden_dim=64, n_regimes=3):
    """Deterministic synthetic init (PyTorch-ish uniform fan-in scaling)."""
    ks = jax.random.split(key, 6)
    half = hidden_dim // 2

    def lin(kw, kb, fan_in, fan_out):
        bound = 1.0 / jnp.sqrt(fan_in)
        w = jax.random.uniform(kw, (fan_in, fan_out), jnp.float32, -bound, bound)
        b = jax.random.uniform(kb, (1, fan_out), jnp.float32, -bound, bound)
        return w, b

    w1, b1 = lin(ks[0], ks[1], in_dim, hidden_dim)
    w2, b2 = lin(ks[2], ks[3], hidden_dim, half)
    w3, b3 = lin(ks[4], ks[5], half, n_regimes)
    return {"w1": w1, "b1": b1, "w2": w2, "b2": b2, "w3": w3, "b3": b3}


if __name__ == "__main__":
    key = jax.random.PRNGKey(0)
    k_x, k_p, k_x2 = jax.random.split(key, 3)

    batch, in_dim, hidden_dim, n_regimes = 8, 32, 64, 3
    params = init_params(k_p, in_dim, hidden_dim, n_regimes)

    def ref_forward(xx):  # plain-JAX f32 reference (eval-mode semantics)
        h1 = jnp.maximum(xx @ params["w1"] + params["b1"], 0.0)
        h2 = jnp.maximum(h1 @ params["w2"] + params["b2"], 0.0)
        return h2 @ params["w3"] + params["b3"]

    # Small-batch path (single grid step, no batch padding needed).
    x = jax.random.normal(k_x, (batch, in_dim), jnp.float32)
    logits = jax.block_until_ready(regime_classifier_forward(x, params))
    assert logits.shape == (batch, n_regimes)
    assert jnp.allclose(logits, ref_forward(x), atol=3e-2, rtol=3e-2)

    # Multi-tile path (B=600 -> 2 balanced 304-row tiles, 8 padded rows).
    x2 = jax.random.normal(k_x2, (600, in_dim), jnp.float32)
    logits2 = jax.block_until_ready(regime_classifier_forward(x2, params))
    assert logits2.shape == (600, n_regimes)
    assert jnp.allclose(logits2, ref_forward(x2), atol=3e-2, rtol=3e-2)

    print("KERNEL_OK")
</pallas_src>

<mosaic_0001>
module attributes {stable_mosaic.version = 11 : i64} {
  func.func @_mlp_kernel(%arg0: i32, %arg1: memref<8x32xf32, #tpu.memory_space<vmem>>, %arg2: memref<32x64xf32, #tpu.memory_space<vmem>>, %arg3: memref<1x64xf32, #tpu.memory_space<vmem>>, %arg4: memref<64x32xf32, #tpu.memory_space<vmem>>, %arg5: memref<1x32xf32, #tpu.memory_space<vmem>>, %arg6: memref<32x3xf32, #tpu.memory_space<vmem>>, %arg7: memref<1x3xf32, #tpu.memory_space<vmem>>, %arg8: memref<8x3xf32, #tpu.memory_space<vmem>>) attributes {dimension_semantics = [#tpu.dimension_semantics<parallel>], iteration_bounds = array<i64: 1>, scalar_prefetch = 0 : i64, scratch_operands = 0 : i64, tpu.core_type = #tpu.core_type<tc>, window_params = [{transform_indices = @transform_0, window_bounds = array<i64: 8, 32>}, {pipeline_mode = #tpu.pipeline_mode<synchronous>, transform_indices = @transform_1, window_bounds = array<i64: 32, 64>}, {pipeline_mode = #tpu.pipeline_mode<synchronous>, transform_indices = @transform_2, window_bounds = array<i64: 1, 64>}, {pipeline_mode = #tpu.pipeline_mode<synchronous>, transform_indices = @transform_3, window_bounds = array<i64: 64, 32>}, {pipeline_mode = #tpu.pipeline_mode<synchronous>, transform_indices = @transform_4, window_bounds = array<i64: 1, 32>}, {pipeline_mode = #tpu.pipeline_mode<synchronous>, transform_indices = @transform_5, window_bounds = array<i64: 32, 3>}, {pipeline_mode = #tpu.pipeline_mode<synchronous>, transform_indices = @transform_6, window_bounds = array<i64: 1, 3>}, {transform_indices = @transform_7, window_bounds = array<i64: 8, 3>}]} {
    %c0 = arith.constant 0 : index
    %c0_0 = arith.constant 0 : index
    %0 = vector.load %arg1[%c0, %c0_0] : memref<8x32xf32, #tpu.memory_space<vmem>>, vector<8x32xf32>
    %1 = arith.truncf %0 : vector<8x32xf32> to vector<8x32xbf16>
    %c0_1 = arith.constant 0 : index
    %c0_2 = arith.constant 0 : index
    %2 = vector.load %arg2[%c0_1, %c0_2] : memref<32x64xf32, #tpu.memory_space<vmem>>, vector<32x64xf32>
    %3 = arith.truncf %2 : vector<32x64xf32> to vector<32x64xbf16>
    %cst = arith.constant dense<0.000000e+00> : vector<8x64xf32>
    %4 = tpu.matmul %1, %3, %cst {dimension_numbers = #tpu.dot_dimension_numbers<[1], [0], [0], [1], [0, 0, 1, 1], [], []>} : vector<8x32xbf16>, vector<32x64xbf16>, vector<8x64xf32> -> vector<8x64xf32>
    %c0_3 = arith.constant 0 : index
    %c0_4 = arith.constant 0 : index
    %5 = vector.load %arg3[%c0_3, %c0_4] : memref<1x64xf32, #tpu.memory_space<vmem>>, vector<1x64xf32>
    %6 = vector.broadcast %5 : vector<1x64xf32> to vector<8x64xf32>
    %7 = arith.addf %4, %6 : vector<8x64xf32>
    %cst_5 = arith.constant 0.000000e+00 : f32
    %8 = vector.broadcast %cst_5 : f32 to vector<8x64xf32>
    %9 = arith.maximumf %7, %8 : vector<8x64xf32>
    %10 = arith.truncf %9 : vector<8x64xf32> to vector<8x64xbf16>
    %c0_6 = arith.constant 0 : index
    %c0_7 = arith.constant 0 : index
    %11 = vector.load %arg4[%c0_6, %c0_7] : memref<64x32xf32, #tpu.memory_space<vmem>>, vector<64x32xf32>
    %12 = arith.truncf %11 : vector<64x32xf32> to vector<64x32xbf16>
    %cst_8 = arith.constant dense<0.000000e+00> : vector<8x32xf32>
    %13 = tpu.matmul %10, %12, %cst_8 {dimension_numbers = #tpu.dot_dimension_numbers<[1], [0], [0], [1], [0, 0, 1, 1], [], []>} : vector<8x64xbf16>, vector<64x32xbf16>, vector<8x32xf32> -> vector<8x32xf32>
    %c0_9 = arith.constant 0 : index
    %c0_10 = arith.constant 0 : index
    %14 = vector.load %arg5[%c0_9, %c0_10] : memref<1x32xf32, #tpu.memory_space<vmem>>, vector<1x32xf32>
    %15 = vector.broadcast %14 : vector<1x32xf32> to vector<8x32xf32>
    %16 = arith.addf %13, %15 : vector<8x32xf32>
    %cst_11 = arith.constant 0.000000e+00 : f32
    %17 = vector.broadcast %cst_11 : f32 to vector<8x32xf32>
    %18 = arith.maximumf %16, %17 : vector<8x32xf32>
    %19 = arith.truncf %18 : vector<8x32xf32> to vector<8x32xbf16>
    %c0_12 = arith.constant 0 : index
    %c0_13 = arith.constant 0 : index
    %20 = vector.load %arg6[%c0_12, %c0_13] : memref<32x3xf32, #tpu.memory_space<vmem>>, vector<32x3xf32>
    %21 = arith.truncf %20 : vector<32x3xf32> to vector<32x3xbf16>
    %cst_14 = arith.constant dense<0.000000e+00> : vector<8x3xf32>
    %22 = tpu.matmul %19, %21, %cst_14 {dimension_numbers = #tpu.dot_dimension_numbers<[1], [0], [0], [1], [0, 0, 1, 1], [], []>} : vector<8x32xbf16>, vector<32x3xbf16>, vector<8x3xf32> -> vector<8x3xf32>
    %c0_15 = arith.constant 0 : index
    %c0_16 = arith.constant 0 : index
    %23 = vector.load %arg7[%c0_15, %c0_16] : memref<1x3xf32, #tpu.memory_space<vmem>>, vector<1x3xf32>
    %24 = vector.broadcast %23 : vector<1x3xf32> to vector<8x3xf32>
    %25 = arith.addf %22, %24 : vector<8x3xf32>
    %c0_17 = arith.constant 0 : index
    %c0_18 = arith.constant 0 : index
    %26 = vector.load %arg8[%c0_17, %c0_18] : memref<8x3xf32, #tpu.memory_space<vmem>>, vector<8x3xf32>
    tpu.vector_store %arg8[%c0_17, %c0_18], %25 {strides = array<i32>} : memref<8x3xf32, #tpu.memory_space<vmem>>, vector<8x3xf32>,
    return
  }
  func.func @transform_0(%arg0: i32) -> (i32, i32) {
    %c0_i32 = arith.constant 0 : i32
    %c0_i32_0 = arith.constant 0 : i32
    return %arg0, %c0_i32 : i32, i32
  }
  func.func @transform_1(%arg0: i32) -> (i32, i32) {
    %c0_i32 = arith.constant 0 : i32
    %c0_i32_0 = arith.constant 0 : i32
    %c0_i32_1 = arith.constant 0 : i32
    return %c0_i32, %c0_i32_0 : i32, i32
  }
  func.func @transform_2(%arg0: i32) -> (i32, i32) {
    %c0_i32 = arith.constant 0 : i32
    %c0_i32_0 = arith.constant 0 : i32
    %c0_i32_1 = arith.constant 0 : i32
    return %c0_i32, %c0_i32_0 : i32, i32
  }
  func.func @transform_3(%arg0: i32) -> (i32, i32) {
    %c0_i32 = arith.constant 0 : i32
    %c0_i32_0 = arith.constant 0 : i32
    %c0_i32_1 = arith.constant 0 : i32
    return %c0_i32, %c0_i32_0 : i32, i32
  }
  func.func @transform_4(%arg0: i32) -> (i32, i32) {
    %c0_i32 = arith.constant 0 : i32
    %c0_i32_0 = arith.constant 0 : i32
    %c0_i32_1 = arith.constant 0 : i32
    return %c0_i32, %c0_i32_0 : i32, i32
  }
  func.func @transform_5(%arg0: i32) -> (i32, i32) {
    %c0_i32 = arith.constant 0 : i32
    %c0_i32_0 = arith.constant 0 : i32
    %c0_i32_1 = arith.constant 0 : i32
    return %c0_i32, %c0_i32_0 : i32, i32
  }
  func.func @transform_6(%arg0: i32) -> (i32, i32) {
    %c0_i32 = arith.constant 0 : i32
    %c0_i32_0 = arith.constant 0 : i32
    %c0_i32_1 = arith.constant 0 : i32
    return %c0_i32, %c0_i32_0 : i32, i32
  }
  func.func @transform_7(%arg0: i32) -> (i32, i32) {
    %c0_i32 = arith.constant 0 : i32
    %c0_i32_0 = arith.constant 0 : i32
    return %arg0, %c0_i32 : i32, i32
  }
}

</mosaic_0001>

<bundles_post_ra>
// kernel: tpu_custom_call.1
= control target key start
LH: loop header
LB: loop body
LE: loop exit
PB: predicated region body
PF: predicated region fallthrough
CT: control target
= control target key end

     0   :  { %v262_v0 = vmov 0.0   ;;  %vm263_vm0 = vmmov 0   ;;  %vm42_vm1 = vcmask 261120   ;;  %vm107_vm2 = vcmask 523264   ;;  %s372_s1 = inlined_call_operand.vmem [shape: f32[32,64], index: 1, kind: input, shape index: {}]   ;;  %s373_s3 = inlined_call_operand.vmem [shape: f32[64,32], index: 3, kind: input, shape index: {}]   ;;  %s374_s0 = inlined_call_operand.vmem [shape: f32[8,32], index: 0, kind: input, shape index: {}]   ;;  %s375_s5 = inlined_call_operand.vmem [shape: f32[32,3], index: 5, kind: input, shape index: {}]   ;;  %s376_s2 = inlined_call_operand.vmem [shape: f32[1,64], index: 2, kind: input, shape index: {}]   ;;  %s377_s4 = inlined_call_operand.vmem [shape: f32[1,32], index: 4, kind: input, shape index: {}]   ;;  %s378_s6 = inlined_call_operand.vmem [shape: f32[1,3], index: 6, kind: input, shape index: {}]   ;;  %s379_s7 = inlined_call_operand.vmem [shape: f32[8,3], index: 7, kind: output, shape index: {}]  }
   0x1   :  { %232 = vmatprep.subr.bf16.mxu0 %v262_v0  ;;  %v29_v1 = vld [vmem:[%s372_s1] sm:$0xff]  ;;  %v30_v2 = vld [vmem:[%s372_s1 + $0x8] sm:$0xff]  ;;  %v31_v3 = vld [vmem:[%s372_s1 + $0x10] sm:$0xff]  ;;  %236 = vmatprep.mubr.msk.bf16.mxu0 %vm263_vm0, %v262_v0  ;;  %vm209_vm3 = vcmask 23552  }
   0x2   :  { %v33_v4 = vpack.c.bf16 %v30_v2, %v29_v1  ;;  %v32_v5 = vld [vmem:[%s372_s1 + $0x18] sm:$0xff]  ;;  %240 = vmatprep.subr.bf16.mxu1 %v262_v0  ;;  %v88_v6 = vld [vmem:[%s373_s3] sm:$0xff]  ;;  %248 = vmatprep.mubr.msk.bf16.mxu1 %vm263_vm0, %v262_v0  ;;  %v89_v7 = vld [vmem:[%s373_s3 + $0x8] sm:$0xff] }
   0x3   :  { %v90_v8 = vld [vmem:[%s373_s3 + $0x10] sm:$0xff]  ;;  %v91_v9 = vld [vmem:[%s373_s3 + $0x18] sm:$0xff]  ;;  %v34_v10 = vpack.c.bf16 %v32_v5, %v31_v3  ;;  %v27_v11 = vld [vmem:[%s374_s0] sm:$0xff]  ;;  %v96_v12 = vpack.c.bf16 %v89_v7, %v88_v6 }
   0x4   :  { %233 = vmatpush3.bf16.msra.mxu0 %v33_v4  ;;  %v97_v13 = vpack.c.bf16 %v91_v9, %v90_v8  ;;  %v28_v14 = vpack.c.bf16 %v27_v11, %v27_v11  ;;  %v92_v15 = vld [vmem:[%s373_s3 + $0x20] sm:$0xff]  ;;  %v93_v16 = vld [vmem:[%s373_s3 + $0x28] sm:$0xff]  ;;  %v94_v18 = vld [vmem:[%s373_s3 + $0x30] sm:$0xff] }
   0x5   :  { %234 = vmatprep.subr.bf16.mxu0 %v262_v0  ;;  %241 = vmatpush3.bf16.msra.mxu1 %v96_v12  ;;  %v98_v17 = vpack.c.bf16 %v93_v16, %v92_v15  ;;  %v95_v19 = vld [vmem:[%s373_s3 + $0x38] sm:$0xff]  ;;  %v153_v21 = vld [vmem:[%s375_s5] sm:$0xff]  ;;  %v154_v22 = vld [vmem:[%s375_s5 + $0x8] sm:$0xff] }
   0x6   :  { %242 = vmatprep.subr.bf16.mxu1 %v262_v0  ;;  %v99_v20 = vpack.c.bf16 %v95_v19, %v94_v18  ;;  %v157_v23 = vpack.c.bf16 %v154_v22, %v153_v21  ;;  %v215_v24 = vld [vmem:[%s376_s2] ss:$0 sm:$0xff]  ;;  %v155_v32 = vld [vmem:[%s375_s5 + $0x10] sm:$0xff]  ;;  %v156_v33 = vld [vmem:[%s375_s5 + $0x18] sm:$0xff] }
   0x7   :  { %v158_v34 = vpack.c.bf16 %v156_v33, %v155_v32  ;;  %v217_v35 = vld [vmem:[%s377_s4] ss:$0 sm:$0xff] }
   0x8   :  { %235 = vmatpush3.bf16.msra.mxu0 %v34_v10  ;;  %v219_v43 = vld [vmem:[%s378_s6] ss:$0 sm:$0xff] }
   0x9   :  { %252 = vmatprep.subr.bf16.mxu0 %v262_v0  ;;  %243 = vmatpush3.bf16.msra.mxu1 %v97_v13 }
   0xa   :  { %244 = vmatprep.subr.bf16.mxu1 %v262_v0 }
   0xb   :  { %237 = vmatmul.mubr.msk.bf16.vlgmr.msra.gmra.mrb[0].mxu0 %vm42_vm1, %v28_v14 }
   0xc   :  { %256 = vmatprep.mubr.msk.bf16.mxu0 %vm263_vm0, %v262_v0  ;;  %253 = vmatpush3.bf16.msra.mxu0 %v157_v23 }
   0xd   :  { %245 = vmatpush3.bf16.msra.mxu1 %v98_v17  ;;  %254 = vmatprep.subr.bf16.mxu0 %v262_v0 }
   0xe   :  { %246 = vmatprep.subr.bf16.mxu1 %v262_v0 }
  0x10   :  { %255 = vmatpush3.bf16.msra.mxu0 %v158_v34 }
  0x11   :  { %247 = vmatpush3.bf16.msra.mxu1 %v99_v20 }
  0xde   :  { %v80_v25 = vpop.f32.mrb[0].mxu0 }
  0xdf   :  { %v81_v26 = vadd.f32 %v215_v24, %v80_v25  ;;  %v238_v27 = vpop.f32.mrb[1].mxu0 }
  0xe0   :  { %v83_v28 = vpop.f32.mrb[2].mxu0 }
  0xe1   :  { %v86_v29 = vmax.f32 %v81_v26, 0.0  ;;  %v239_v30 = vpop.f32.mrb[3].mxu0 }
  0xe3   :  { %v87_v31 = vpack.c.bf16 %v86_v29, %v86_v29 }
  0xe5   :  { %249 = vmatmul.mubr.msk.bf16.vlgmr.msra.gmra.mrb[0].mxu1 %vm107_vm2, %v87_v31 }
 0x1b8   :  { %v145_v36 = vpop.f32.mrb[0].mxu1 }
 0x1b9   :  { %v146_v37 = vadd.f32 %v217_v35, %v145_v36  ;;  %v250_v38 = vpop.f32.mrb[1].mxu1 }
 0x1ba   :  { %v148_v39 = vpop.f32.mrb[2].mxu1 }
 0x1bb   :  { %v151_v40 = vmax.f32 %v146_v37, 0.0  ;;  %v251_v41 = vpop.f32.mrb[3].mxu1 }
 0x1bd   :  { %v152_v42 = vpack.c.bf16 %v151_v40, %v151_v40 }
 0x1bf   :  { %257 = vmatmul.mubr.msk.bf16.vlgmr.msra.gmra.mrb[4].mxu0 %vm42_vm1, %v152_v42 }
 0x292   :  { %v203_v44 = vpop.f32.mrb[4].mxu0 }
 0x293   :  { %v204_v45 = vadd.f32 %v219_v43, %v203_v44  ;;  %v258_v46 = vpop.f32.mrb[5].mxu0 }
 0x294   :  { %v206_v47 = vpop.f32.mrb[6].mxu0 }
 0x295   :  { %210 = vst.msk [vmem:[%s379_s7] sm:$0xff] %vm209_vm3, %v204_v45  ;;  %v259_v48 = vpop.f32.mrb[7].mxu0 }

</bundles_post_ra>
